<compile_context>
chip_gen: v6e
topology: v6e:2x2x1
jax: 0.10.0
libtpu: 0.0.40
codegen_flags: <defaults>
</compile_context>

<pallas_src>
import jax
import jax.numpy as jnp
from jax import lax
from jax.experimental import pallas as pl
from jax.experimental.pallas import tpu as pltpu

_MXU_DTYPE = jnp.bfloat16      # MXU operand dtype; accumulation stays f32.


def _round_up(x, m):
    return (x + m - 1) // m * m


def _select_config():
    """Generation-aware (block_rows, vmem_limit_bytes)."""
    try:
        vmem = pltpu.get_tpu_info().vmem_capacity_bytes
    except Exception:
        vmem = None
    if vmem is not None and vmem >= 100 * 1024 * 1024:   # v5e / v6e (128 MiB)
        return 1024, 96 * 1024 * 1024
    return 512, 48 * 1024 * 1024                          # v7x (64 MiB/TC) / unknown


_BLOCK_ROWS, _VMEM_LIMIT = _select_config()

# Single-buffer the constant-index (VMEM-resident) weight specs if supported.
try:
    _WEIGHT_PIPELINE_KWARGS = {"pipeline_mode": pl.Buffered(1)}
    pl.BlockSpec((8, 128), lambda i: (0, 0), **_WEIGHT_PIPELINE_KWARGS)
except Exception:  # older JAX without pipeline_mode -> default double-buffering
    _WEIGHT_PIPELINE_KWARGS = {}


def _choose_tiling(batch, block_rows):
    """Batch tile size bounding padding waste; >=2 tiles when batch is large
    enough so the second v7x TensorCore gets balanced work."""
    n_tiles = max(pl.cdiv(batch, block_rows), 2 if batch >= 256 else 1)
    tb = _round_up(pl.cdiv(batch, n_tiles), 8)
    n_tiles = pl.cdiv(batch, tb)
    return tb, n_tiles


def _mlp_kernel(stu_ids_ref, exer_ids_ref,           # scalar prefetch (SMEM)
                stu_tab_ref, bert_tab_ref,           # embedding tables (HBM, pl.ANY)
                w1e_ref, w1s_ref, b1_ref,            # VMEM-resident weights/biases
                w2_ref, b2_ref, w3_ref, b3_ref,
                logit_ref, ex_out_ref, st_out_ref,   # outputs
                ex_buf, st_buf, sem):                # scratch
    tb = ex_buf.shape[0]
    base = pl.program_id(0) * tb

    # ---- DMA-gather the tb embedding rows of this batch tile ----------------
    def _issue(r, carry):
        e = exer_ids_ref[base + r]
        s = stu_ids_ref[base + r]
        pltpu.make_async_copy(bert_tab_ref.at[pl.ds(e, 1), :],
                              ex_buf.at[pl.ds(r, 1), :], sem.at[0]).start()
        pltpu.make_async_copy(stu_tab_ref.at[pl.ds(s, 1), :],
                              st_buf.at[pl.ds(r, 1), :], sem.at[1]).start()
        return carry

    lax.fori_loop(0, tb, _issue, 0)

    def _wait(r, carry):
        pltpu.make_async_copy(bert_tab_ref.at[pl.ds(0, 1), :],
                              ex_buf.at[pl.ds(0, 1), :], sem.at[0]).wait()
        pltpu.make_async_copy(stu_tab_ref.at[pl.ds(0, 1), :],
                              st_buf.at[pl.ds(0, 1), :], sem.at[1]).wait()
        return carry

    lax.fori_loop(0, tb, _wait, 0)

    ex = ex_buf[...]                                  # [TB, D] f32 (exer_emb rows)
    st = st_buf[...]                                  # [TB, D] f32 (proficiency rows)
    ex_out_ref[...] = ex                              # module also returns these
    st_out_ref[...] = st

    # ---- prednet: Linear(2D,2D)+Sigmoid -> Linear(2D,D)+Sigmoid -> Linear(D,1)
    # Dropout(p=0.5) layers are identity (eval mode).
    # Concat-free layer 1: [ex, st] @ W1 == ex @ W1[:D] + st @ W1[D:].
    h1 = (jnp.dot(ex.astype(_MXU_DTYPE), w1e_ref[...],
                  preferred_element_type=jnp.float32)
          + jnp.dot(st.astype(_MXU_DTYPE), w1s_ref[...],
                    preferred_element_type=jnp.float32)
          + b1_ref[...])
    h1 = jax.nn.sigmoid(h1)                           # [TB, 2D] f32

    h2 = jnp.dot(h1.astype(_MXU_DTYPE), w2_ref[...],
                 preferred_element_type=jnp.float32) + b2_ref[...]
    h2 = jax.nn.sigmoid(h2)                           # [TB, D] f32

    # Final Linear(D,1) + output sigmoid, produced directly as a lane-dense
    # [1, TB] row: w3_row [1, D] contracted with h2 [TB, D] over D (NT matmul).
    logits = lax.dot_general(w3_ref[...], h2.astype(_MXU_DTYPE),
                             dimension_numbers=(((1,), (1,)), ((), ())),
                             preferred_element_type=jnp.float32)   # [1, TB]
    logit_ref[...] = jax.nn.sigmoid(logits + b3_ref[...])


def prednet_pallas(stu_ids, exer_in, stu_table, bert_table, kp):
    """Fused gather + prednet. Returns (output [B], exer_emb [B,D], prof [B,D])."""
    B = stu_ids.shape[0]
    D = stu_table.shape[1]
    D2 = 2 * D

    tb, n_tiles = _choose_tiling(B, _BLOCK_ROWS)
    b_pad = tb * n_tiles

    sid = stu_ids.astype(jnp.int32)
    eid = exer_in.astype(jnp.int32)
    if b_pad != B:                                    # pad ids with valid row 0
        sid = jnp.pad(sid, (0, b_pad - B))
        eid = jnp.pad(eid, (0, b_pad - B))

    def _resident(shape):
        # Whole-array block, constant index -> stays VMEM-resident; single-buffered.
        return pl.BlockSpec(shape, lambda i, sids, eids: (0, 0),
                            **_WEIGHT_PIPELINE_KWARGS)

    cost = pl.CostEstimate(
        flops=2 * b_pad * (D2 * D2 + D2 * D + D),
        transcendentals=b_pad * (D2 + D + 1),
        bytes_accessed=(4 * b_pad * D * 4              # gather reads + emb writes
                        + b_pad * 4                    # logits out
                        + (kp["w1e"].size + kp["w1s"].size
                           + kp["w2"].size + kp["w3t"].size) * 2
                        + (kp["b1"].size + kp["b2"].size + kp["b3"].size) * 4),
    )

    logit_rows, exer_emb, proficiency = pl.pallas_call(
        _mlp_kernel,
        out_shape=(
            jax.ShapeDtypeStruct((n_tiles, tb), jnp.float32),   # sigmoid(logits)
            jax.ShapeDtypeStruct((b_pad, D), jnp.float32),      # exer_emb
            jax.ShapeDtypeStruct((b_pad, D), jnp.float32),      # proficiency
        ),
        grid_spec=pltpu.PrefetchScalarGridSpec(
            num_scalar_prefetch=2,                    # stu_ids, exer_in -> SMEM
            grid=(n_tiles,),
            in_specs=[
                pl.BlockSpec(memory_space=pl.ANY),    # student embedding table (HBM)
                pl.BlockSpec(memory_space=pl.ANY),    # BERT exercise table (HBM)
                _resident((D, D2)),                   # W1 (exercise half)
                _resident((D, D2)),                   # W1 (student half)
                _resident((1, D2)),                   # b1
                _resident((D2, D)),                   # W2
                _resident((1, D)),                    # b2
                _resident((1, D)),                    # W3^T row
                _resident((1, 1)),                    # b3
            ],
            out_specs=(
                pl.BlockSpec((1, tb), lambda i, sids, eids: (i, 0)),
                pl.BlockSpec((tb, D), lambda i, sids, eids: (i, 0)),
                pl.BlockSpec((tb, D), lambda i, sids, eids: (i, 0)),
            ),
            scratch_shapes=[
                pltpu.VMEM((tb, D), jnp.float32),     # gathered exercise rows
                pltpu.VMEM((tb, D), jnp.float32),     # gathered student rows
                pltpu.SemaphoreType.DMA((2,)),
            ],
        ),
        compiler_params=pltpu.CompilerParams(
            dimension_semantics=("parallel",),        # megacore batch split on v7x
            vmem_limit_bytes=_VMEM_LIMIT,
        ),
        cost_estimate=cost,
    )(sid, eid, stu_table, bert_table,
      kp["w1e"], kp["w1s"], kp["b1"], kp["w2"], kp["b2"], kp["w3t"], kp["b3"])

    output = logit_rows.reshape(b_pad)[:B]            # [B]
    return output, exer_emb[:B], proficiency[:B]


def xavier_uniform(key, fan_in, fan_out):
    # nn.init.xavier_uniform_ (symmetric in fan_in/fan_out); stored as [in, out]
    # for the x @ W convention.
    limit = jnp.sqrt(6.0 / (fan_in + fan_out))
    return jax.random.uniform(key, (fan_in, fan_out), jnp.float32, -limit, limit)


def init_params(key, num_students, num_exercises, d_model):
    ks = jax.random.split(key, 5)
    return {
        # frozen "BERT" exercise-text embedding table (synthetic stand-in for the .npy)
        "bert_emb": jax.random.normal(ks[0], (num_exercises, d_model), jnp.float32),
        # nn.init.normal_(std=0.1)
        "stu_emb": 0.1 * jax.random.normal(ks[1], (num_students, d_model), jnp.float32),
        "w1": xavier_uniform(ks[2], 2 * d_model, 2 * d_model),
        "b1": jnp.zeros((1, 2 * d_model), jnp.float32),
        "w2": xavier_uniform(ks[3], 2 * d_model, d_model),
        "b2": jnp.zeros((1, d_model), jnp.float32),
        "w3": xavier_uniform(ks[4], d_model, 1),
        "b3": jnp.zeros((1, 1), jnp.float32),
    }


def prepare_params(params):
    """One-time weight preprocessing (hoisted off the per-call hot path)."""
    D = params["stu_emb"].shape[1]
    w1 = params["w1"]
    return {
        "stu_emb": params["stu_emb"],
        "bert_emb": params["bert_emb"],
        "w1e": w1[:D].astype(_MXU_DTYPE),             # exercise half of W1
        "w1s": w1[D:].astype(_MXU_DTYPE),             # student half of W1
        "b1": params["b1"].astype(jnp.float32),
        "w2": params["w2"].astype(_MXU_DTYPE),
        "b2": params["b2"].astype(jnp.float32),
        "w3t": params["w3"].T.astype(_MXU_DTYPE),     # [1, D]
        "b3": params["b3"].astype(jnp.float32),       # [1, 1]
    }


@jax.jit
def baseline_mlp_forward(kernel_params, stu_ids, exer_in):
    """Mirrors Baseline_MLP.forward: returns (output, exer_emb, proficiency)."""
    return prednet_pallas(stu_ids, exer_in,
                          kernel_params["stu_emb"], kernel_params["bert_emb"],
                          kernel_params)


if __name__ == "__main__":
    key = jax.random.PRNGKey(0)
    num_students, num_exercises, d_model, batch = 16, 16, 32, 8

    pkey, ikey1, ikey2 = jax.random.split(key, 3)
    raw_params = init_params(pkey, num_students, num_exercises, d_model)
    kernel_params = prepare_params(raw_params)        # one-time weight prep

    stu_ids = jax.random.randint(ikey1, (batch,), 0, num_students, dtype=jnp.int32)
    exer_in = jax.random.randint(ikey2, (batch,), 0, num_exercises, dtype=jnp.int32)

    output, exer_emb, proficiency = baseline_mlp_forward(kernel_params, stu_ids, exer_in)
    jax.block_until_ready((output, exer_emb, proficiency))

    # Pure-JAX f32 reference (bf16 MXU operands in-kernel -> loose tolerance on logits).
    prof_ref = jnp.take(raw_params["stu_emb"], stu_ids, axis=0)
    exer_ref = jnp.take(raw_params["bert_emb"], exer_in, axis=0)
    x = jnp.concatenate([exer_ref, prof_ref], axis=1)
    h1 = jax.nn.sigmoid(x @ raw_params["w1"] + raw_params["b1"])
    h2 = jax.nn.sigmoid(h1 @ raw_params["w2"] + raw_params["b2"])
    out_ref = jax.nn.sigmoid(h2 @ raw_params["w3"] + raw_params["b3"]).squeeze(-1)

    assert output.shape == (batch,)
    assert exer_emb.shape == (batch, d_model)
    assert proficiency.shape == (batch, d_model)
    assert bool(jnp.allclose(exer_emb, exer_ref, atol=1e-6))
    assert bool(jnp.allclose(proficiency, prof_ref, atol=1e-6))
    assert bool(jnp.all(jnp.isfinite(output)))
    assert bool(jnp.allclose(output, out_ref, atol=3e-2))
    print("KERNEL_OK")
</pallas_src>

<mosaic_0001>
module attributes {stable_mosaic.version = 11 : i64} {
  func.func @_mlp_kernel(%arg0: i32, %arg1: memref<8xi32, #tpu.memory_space<smem>>, %arg2: memref<8xi32, #tpu.memory_space<smem>>, %arg3: memref<16x32xf32, #tpu.memory_space<any>>, %arg4: memref<16x32xf32, #tpu.memory_space<any>>, %arg5: memref<32x64xbf16, #tpu.memory_space<vmem>>, %arg6: memref<32x64xbf16, #tpu.memory_space<vmem>>, %arg7: memref<1x64xf32, #tpu.memory_space<vmem>>, %arg8: memref<64x32xbf16, #tpu.memory_space<vmem>>, %arg9: memref<1x32xf32, #tpu.memory_space<vmem>>, %arg10: memref<1x32xbf16, #tpu.memory_space<vmem>>, %arg11: memref<1x1xf32, #tpu.memory_space<vmem>>, %arg12: memref<1x8xf32, #tpu.memory_space<vmem>>, %arg13: memref<8x32xf32, #tpu.memory_space<vmem>>, %arg14: memref<8x32xf32, #tpu.memory_space<vmem>>, %arg15: memref<8x32xf32, #tpu.memory_space<vmem>>, %arg16: memref<8x32xf32, #tpu.memory_space<vmem>>, %arg17: memref<2x!tpu.dma_semaphore, #tpu.memory_space<semaphore_mem>>) attributes {dimension_semantics = [#tpu.dimension_semantics<parallel>], iteration_bounds = array<i64: 1>, scalar_prefetch = 2 : i64, scratch_operands = 3 : i64, tpu.core_type = #tpu.core_type<tc>, window_params = [{}, {}, {pipeline_mode = #tpu.pipeline_mode<synchronous>, transform_indices = @transform_2, window_bounds = array<i64: 32, 64>}, {pipeline_mode = #tpu.pipeline_mode<synchronous>, transform_indices = @transform_3, window_bounds = array<i64: 32, 64>}, {pipeline_mode = #tpu.pipeline_mode<synchronous>, transform_indices = @transform_4, window_bounds = array<i64: 1, 64>}, {pipeline_mode = #tpu.pipeline_mode<synchronous>, transform_indices = @transform_5, window_bounds = array<i64: 64, 32>}, {pipeline_mode = #tpu.pipeline_mode<synchronous>, transform_indices = @transform_6, window_bounds = array<i64: 1, 32>}, {pipeline_mode = #tpu.pipeline_mode<synchronous>, transform_indices = @transform_7, window_bounds = array<i64: 1, 32>}, {pipeline_mode = #tpu.pipeline_mode<synchronous>, transform_indices = @transform_8, window_bounds = array<i64: 1, 1>}, {transform_indices = @transform_9, window_bounds = array<i64: 1, 8>}, {transform_indices = @transform_10, window_bounds = array<i64: 8, 32>}, {transform_indices = @transform_11, window_bounds = array<i64: 8, 32>}]} {
    %c8_i32 = arith.constant 8 : i32
    %0 = arith.muli %arg0, %c8_i32 : i32
    %c0_i32 = arith.constant 0 : i32
    %c8_i32_0 = arith.constant 8 : i32
    %1 = arith.addi %c0_i32, %c8_i32_0 : i32
    %c1_i32 = arith.constant 1 : i32
    scf.for %arg18 = %c0_i32 to %1 step %c1_i32  : i32 {
      %45 = arith.addi %0, %arg18 : i32
      %46 = arith.index_cast %45 : i32 to index
      %47 = memref.load %arg2[%46] : memref<8xi32, #tpu.memory_space<smem>>
      %48 = arith.addi %0, %arg18 : i32
      %49 = arith.index_cast %48 : i32 to index
      %50 = memref.load %arg1[%49] : memref<8xi32, #tpu.memory_space<smem>>
      %c0_i32_34 = arith.constant 0 : i32
      %c0_i32_35 = arith.constant 0 : i32
      %51 = tpu.memref_slice %arg4[%47, %c0_i32_35] : memref<16x32xf32, #tpu.memory_space<any>> -> memref<1x32xf32, #tpu.memory_space<any>>
      %c0_i32_36 = arith.constant 0 : i32
      %52 = tpu.memref_slice %arg15[%arg18, %c0_i32_36] : memref<8x32xf32, #tpu.memory_space<vmem>> -> memref<1x32xf32, #tpu.memory_space<vmem>>
      %53 = tpu.memref_slice %arg17[%c0_i32_34] : memref<2x!tpu.dma_semaphore, #tpu.memory_space<semaphore_mem>> -> memref<1x!tpu.dma_semaphore, #tpu.memory_space<semaphore_mem>>
      %54 = tpu.memref_squeeze %53 : memref<1x!tpu.dma_semaphore, #tpu.memory_space<semaphore_mem>> -> memref<!tpu.dma_semaphore, #tpu.memory_space<semaphore_mem>>
      tpu.enqueue_dma source(%51 : memref<1x32xf32, #tpu.memory_space<any>>) target(%52 : memref<1x32xf32, #tpu.memory_space<vmem>>) target_semaphore(%54 : memref<!tpu.dma_semaphore, #tpu.memory_space<semaphore_mem>>)
      %c1_i32_37 = arith.constant 1 : i32
      %c0_i32_38 = arith.constant 0 : i32
      %55 = tpu.memref_slice %arg3[%50, %c0_i32_38] : memref<16x32xf32, #tpu.memory_space<any>> -> memref<1x32xf32, #tpu.memory_space<any>>
      %c0_i32_39 = arith.constant 0 : i32
      %56 = tpu.memref_slice %arg16[%arg18, %c0_i32_39] : memref<8x32xf32, #tpu.memory_space<vmem>> -> memref<1x32xf32, #tpu.memory_space<vmem>>
      %57 = tpu.memref_slice %arg17[%c1_i32_37] : memref<2x!tpu.dma_semaphore, #tpu.memory_space<semaphore_mem>> -> memref<1x!tpu.dma_semaphore, #tpu.memory_space<semaphore_mem>>
      %58 = tpu.memref_squeeze %57 : memref<1x!tpu.dma_semaphore, #tpu.memory_space<semaphore_mem>> -> memref<!tpu.dma_semaphore, #tpu.memory_space<semaphore_mem>>
      tpu.enqueue_dma source(%55 : memref<1x32xf32, #tpu.memory_space<any>>) target(%56 : memref<1x32xf32, #tpu.memory_space<vmem>>) target_semaphore(%58 : memref<!tpu.dma_semaphore, #tpu.memory_space<semaphore_mem>>)
    }
    %c8_i32_1 = arith.constant 8 : i32
    %c0_i32_2 = arith.constant 0 : i32
    %c8_i32_3 = arith.constant 8 : i32
    %2 = arith.addi %c0_i32_2, %c8_i32_3 : i32
    %c1_i32_4 = arith.constant 1 : i32
    scf.for %arg18 = %c0_i32_2 to %2 step %c1_i32_4  : i32 {
      %c0_i32_34 = arith.constant 0 : i32
      %c0_i32_35 = arith.constant 0 : i32
      %c0_i32_36 = arith.constant 0 : i32
      %45 = tpu.memref_slice %arg4[%c0_i32_35, %c0_i32_36] : memref<16x32xf32, #tpu.memory_space<any>> -> memref<1x32xf32, #tpu.memory_space<any>>
      %c0_i32_37 = arith.constant 0 : i32
      %c0_i32_38 = arith.constant 0 : i32
      %46 = tpu.memref_slice %arg15[%c0_i32_37, %c0_i32_38] : memref<8x32xf32, #tpu.memory_space<vmem>> -> memref<1x32xf32, #tpu.memory_space<vmem>>
      %47 = tpu.memref_slice %arg17[%c0_i32_34] : memref<2x!tpu.dma_semaphore, #tpu.memory_space<semaphore_mem>> -> memref<1x!tpu.dma_semaphore, #tpu.memory_space<semaphore_mem>>
      %48 = tpu.memref_squeeze %47 : memref<1x!tpu.dma_semaphore, #tpu.memory_space<semaphore_mem>> -> memref<!tpu.dma_semaphore, #tpu.memory_space<semaphore_mem>>
      tpu.wait_dma2 semaphore(%48 : memref<!tpu.dma_semaphore, #tpu.memory_space<semaphore_mem>>) src(%45 : memref<1x32xf32, #tpu.memory_space<any>>) dst(%46 : memref<1x32xf32, #tpu.memory_space<vmem>>)
      %c1_i32_39 = arith.constant 1 : i32
      %c0_i32_40 = arith.constant 0 : i32
      %c0_i32_41 = arith.constant 0 : i32
      %49 = tpu.memref_slice %arg3[%c0_i32_40, %c0_i32_41] : memref<16x32xf32, #tpu.memory_space<any>> -> memref<1x32xf32, #tpu.memory_space<any>>
      %c0_i32_42 = arith.constant 0 : i32
      %c0_i32_43 = arith.constant 0 : i32
      %50 = tpu.memref_slice %arg16[%c0_i32_42, %c0_i32_43] : memref<8x32xf32, #tpu.memory_space<vmem>> -> memref<1x32xf32, #tpu.memory_space<vmem>>
      %51 = tpu.memref_slice %arg17[%c1_i32_39] : memref<2x!tpu.dma_semaphore, #tpu.memory_space<semaphore_mem>> -> memref<1x!tpu.dma_semaphore, #tpu.memory_space<semaphore_mem>>
      %52 = tpu.memref_squeeze %51 : memref<1x!tpu.dma_semaphore, #tpu.memory_space<semaphore_mem>> -> memref<!tpu.dma_semaphore, #tpu.memory_space<semaphore_mem>>
      tpu.wait_dma2 semaphore(%52 : memref<!tpu.dma_semaphore, #tpu.memory_space<semaphore_mem>>) src(%49 : memref<1x32xf32, #tpu.memory_space<any>>) dst(%50 : memref<1x32xf32, #tpu.memory_space<vmem>>)
    }
    %c0 = arith.constant 0 : index
    %c0_5 = arith.constant 0 : index
    %3 = vector.load %arg15[%c0, %c0_5] : memref<8x32xf32, #tpu.memory_space<vmem>>, vector<8x32xf32>
    %c0_6 = arith.constant 0 : index
    %c0_7 = arith.constant 0 : index
    %4 = vector.load %arg16[%c0_6, %c0_7] : memref<8x32xf32, #tpu.memory_space<vmem>>, vector<8x32xf32>
    %c0_8 = arith.constant 0 : index
    %c0_9 = arith.constant 0 : index
    %5 = vector.load %arg13[%c0_8, %c0_9] : memref<8x32xf32, #tpu.memory_space<vmem>>, vector<8x32xf32>
    tpu.vector_store %arg13[%c0_8, %c0_9], %3 {strides = array<i32>} : memref<8x32xf32, #tpu.memory_space<vmem>>, vector<8x32xf32>,
    %c0_10 = arith.constant 0 : index
    %c0_11 = arith.constant 0 : index
    %6 = vector.load %arg14[%c0_10, %c0_11] : memref<8x32xf32, #tpu.memory_space<vmem>>, vector<8x32xf32>
    tpu.vector_store %arg14[%c0_10, %c0_11], %4 {strides = array<i32>} : memref<8x32xf32, #tpu.memory_space<vmem>>, vector<8x32xf32>,
    %7 = arith.truncf %3 : vector<8x32xf32> to vector<8x32xbf16>
    %c0_12 = arith.constant 0 : index
    %c0_13 = arith.constant 0 : index
    %8 = vector.load %arg5[%c0_12, %c0_13] : memref<32x64xbf16, #tpu.memory_space<vmem>>, vector<32x64xbf16>
    %cst = arith.constant dense<0.000000e+00> : vector<8x64xf32>
    %9 = tpu.matmul %7, %8, %cst {dimension_numbers = #tpu.dot_dimension_numbers<[1], [0], [0], [1], [0, 0, 1, 1], [], []>} : vector<8x32xbf16>, vector<32x64xbf16>, vector<8x64xf32> -> vector<8x64xf32>
    %10 = arith.truncf %4 : vector<8x32xf32> to vector<8x32xbf16>
    %c0_14 = arith.constant 0 : index
    %c0_15 = arith.constant 0 : index
    %11 = vector.load %arg6[%c0_14, %c0_15] : memref<32x64xbf16, #tpu.memory_space<vmem>>, vector<32x64xbf16>
    %cst_16 = arith.constant dense<0.000000e+00> : vector<8x64xf32>
    %12 = tpu.matmul %10, %11, %cst_16 {dimension_numbers = #tpu.dot_dimension_numbers<[1], [0], [0], [1], [0, 0, 1, 1], [], []>} : vector<8x32xbf16>, vector<32x64xbf16>, vector<8x64xf32> -> vector<8x64xf32>
    %13 = arith.addf %9, %12 : vector<8x64xf32>
    %c0_17 = arith.constant 0 : index
    %c0_18 = arith.constant 0 : index
    %14 = vector.load %arg7[%c0_17, %c0_18] : memref<1x64xf32, #tpu.memory_space<vmem>>, vector<1x64xf32>
    %15 = vector.broadcast %14 : vector<1x64xf32> to vector<8x64xf32>
    %16 = arith.addf %13, %15 : vector<8x64xf32>
    %17 = arith.negf %16 : vector<8x64xf32>
    %18 = math.exp %17 : vector<8x64xf32>
    %cst_19 = arith.constant 1.000000e+00 : f32
    %19 = vector.broadcast %cst_19 : f32 to vector<8x64xf32>
    %20 = arith.addf %19, %18 : vector<8x64xf32>
    %21 = arith.divf %19, %20 : vector<8x64xf32>
    %22 = arith.truncf %21 : vector<8x64xf32> to vector<8x64xbf16>
    %c0_20 = arith.constant 0 : index
    %c0_21 = arith.constant 0 : index
    %23 = vector.load %arg8[%c0_20, %c0_21] : memref<64x32xbf16, #tpu.memory_space<vmem>>, vector<64x32xbf16>
    %cst_22 = arith.constant dense<0.000000e+00> : vector<8x32xf32>
    %24 = tpu.matmul %22, %23, %cst_22 {dimension_numbers = #tpu.dot_dimension_numbers<[1], [0], [0], [1], [0, 0, 1, 1], [], []>} : vector<8x64xbf16>, vector<64x32xbf16>, vector<8x32xf32> -> vector<8x32xf32>
    %c0_23 = arith.constant 0 : index
    %c0_24 = arith.constant 0 : index
    %25 = vector.load %arg9[%c0_23, %c0_24] : memref<1x32xf32, #tpu.memory_space<vmem>>, vector<1x32xf32>
    %26 = vector.broadcast %25 : vector<1x32xf32> to vector<8x32xf32>
    %27 = arith.addf %24, %26 : vector<8x32xf32>
    %28 = arith.negf %27 : vector<8x32xf32>
    %29 = math.exp %28 : vector<8x32xf32>
    %cst_25 = arith.constant 1.000000e+00 : f32
    %30 = vector.broadcast %cst_25 : f32 to vector<8x32xf32>
    %31 = arith.addf %30, %29 : vector<8x32xf32>
    %32 = arith.divf %30, %31 : vector<8x32xf32>
    %c0_26 = arith.constant 0 : index
    %c0_27 = arith.constant 0 : index
    %33 = vector.load %arg10[%c0_26, %c0_27] : memref<1x32xbf16, #tpu.memory_space<vmem>>, vector<1x32xbf16>
    %34 = arith.truncf %32 : vector<8x32xf32> to vector<8x32xbf16>
    %cst_28 = arith.constant dense<0.000000e+00> : vector<1x8xf32>
    %35 = tpu.matmul %33, %34, %cst_28 {dimension_numbers = #tpu.dot_dimension_numbers<[1], [1], [0], [0], [0, 0, 1, 0], [], []>} : vector<1x32xbf16>, vector<8x32xbf16>, vector<1x8xf32> -> vector<1x8xf32>
    %c0_29 = arith.constant 0 : index
    %c0_30 = arith.constant 0 : index
    %36 = vector.load %arg11[%c0_29, %c0_30] : memref<1x1xf32, #tpu.memory_space<vmem>>, vector<1x1xf32>
    %37 = vector.broadcast %36 : vector<1x1xf32> to vector<1x8xf32>
    %38 = arith.addf %35, %37 : vector<1x8xf32>
    %39 = arith.negf %38 : vector<1x8xf32>
    %40 = math.exp %39 : vector<1x8xf32>
    %cst_31 = arith.constant 1.000000e+00 : f32
    %41 = vector.broadcast %cst_31 : f32 to vector<1x8xf32>
    %42 = arith.addf %41, %40 : vector<1x8xf32>
    %43 = arith.divf %41, %42 : vector<1x8xf32>
    %c0_32 = arith.constant 0 : index
    %c0_33 = arith.constant 0 : index
    %44 = vector.load %arg12[%c0_32, %c0_33] : memref<1x8xf32, #tpu.memory_space<vmem>>, vector<1x8xf32>
    tpu.vector_store %arg12[%c0_32, %c0_33], %43 {strides = array<i32>} : memref<1x8xf32, #tpu.memory_space<vmem>>, vector<1x8xf32>,
    return
  }
  func.func @transform_2(%arg0: i32, %arg1: memref<8xi32, #tpu.memory_space<smem>>, %arg2: memref<8xi32, #tpu.memory_space<smem>>) -> (i32, i32) {
    %c0_i32 = arith.constant 0 : i32
    %c0_i32_0 = arith.constant 0 : i32
    %c0_i32_1 = arith.constant 0 : i32
    return %c0_i32, %c0_i32_0 : i32, i32
  }
  func.func @transform_3(%arg0: i32, %arg1: memref<8xi32, #tpu.memory_space<smem>>, %arg2: memref<8xi32, #tpu.memory_space<smem>>) -> (i32, i32) {
    %c0_i32 = arith.constant 0 : i32
    %c0_i32_0 = arith.constant 0 : i32
    %c0_i32_1 = arith.constant 0 : i32
    return %c0_i32, %c0_i32_0 : i32, i32
  }
  func.func @transform_4(%arg0: i32, %arg1: memref<8xi32, #tpu.memory_space<smem>>, %arg2: memref<8xi32, #tpu.memory_space<smem>>) -> (i32, i32) {
    %c0_i32 = arith.constant 0 : i32
    %c0_i32_0 = arith.constant 0 : i32
    %c0_i32_1 = arith.constant 0 : i32
    return %c0_i32, %c0_i32_0 : i32, i32
  }
  func.func @transform_5(%arg0: i32, %arg1: memref<8xi32, #tpu.memory_space<smem>>, %arg2: memref<8xi32, #tpu.memory_space<smem>>) -> (i32, i32) {
    %c0_i32 = arith.constant 0 : i32
    %c0_i32_0 = arith.constant 0 : i32
    %c0_i32_1 = arith.constant 0 : i32
    return %c0_i32, %c0_i32_0 : i32, i32
  }
  func.func @transform_6(%arg0: i32, %arg1: memref<8xi32, #tpu.memory_space<smem>>, %arg2: memref<8xi32, #tpu.memory_space<smem>>) -> (i32, i32) {
    %c0_i32 = arith.constant 0 : i32
    %c0_i32_0 = arith.constant 0 : i32
    %c0_i32_1 = arith.constant 0 : i32
    return %c0_i32, %c0_i32_0 : i32, i32
  }
  func.func @transform_7(%arg0: i32, %arg1: memref<8xi32, #tpu.memory_space<smem>>, %arg2: memref<8xi32, #tpu.memory_space<smem>>) -> (i32, i32) {
    %c0_i32 = arith.constant 0 : i32
    %c0_i32_0 = arith.constant 0 : i32
    %c0_i32_1 = arith.constant 0 : i32
    return %c0_i32, %c0_i32_0 : i32, i32
  }
  func.func @transform_8(%arg0: i32, %arg1: memref<8xi32, #tpu.memory_space<smem>>, %arg2: memref<8xi32, #tpu.memory_space<smem>>) -> (i32, i32) {
    %c0_i32 = arith.constant 0 : i32
    %c0_i32_0 = arith.constant 0 : i32
    %c0_i32_1 = arith.constant 0 : i32
    return %c0_i32, %c0_i32_0 : i32, i32
  }
  func.func @transform_9(%arg0: i32, %arg1: memref<8xi32, #tpu.memory_space<smem>>, %arg2: memref<8xi32, #tpu.memory_space<smem>>) -> (i32, i32) {
    %c0_i32 = arith.constant 0 : i32
    %c0_i32_0 = arith.constant 0 : i32
    return %arg0, %c0_i32 : i32, i32
  }
  func.func @transform_10(%arg0: i32, %arg1: memref<8xi32, #tpu.memory_space<smem>>, %arg2: memref<8xi32, #tpu.memory_space<smem>>) -> (i32, i32) {
    %c0_i32 = arith.constant 0 : i32
    %c0_i32_0 = arith.constant 0 : i32
    return %arg0, %c0_i32 : i32, i32
  }
  func.func @transform_11(%arg0: i32, %arg1: memref<8xi32, #tpu.memory_space<smem>>, %arg2: memref<8xi32, #tpu.memory_space<smem>>) -> (i32, i32) {
    %c0_i32 = arith.constant 0 : i32
    %c0_i32_0 = arith.constant 0 : i32
    return %arg0, %c0_i32 : i32, i32
  }
}

</mosaic_0001>

<bundles_post_ra>
// kernel: baseline_mlp_forward.1
= control target key start
LH: loop header
LB: loop body
LE: loop exit
PB: predicated region body
PF: predicated region fallthrough
CT: control target
= control target key end

     0   :  { %s993_s0 = inlined_call_operand.vmem [shape: s32[8], index: 0, kind: input, shape index: {}]   ;;  %s994_s2 = inlined_call_operand.vmem [shape: f32[16,32], index: 2, kind: input, shape index: {}]   ;;  %s995_s3 = inlined_call_operand.vmem [shape: f32[16,32], index: 3, kind: input, shape index: {}]   ;;  %s996_s4 = inlined_call_operand.vmem [shape: bf16[32,64], index: 4, kind: input, shape index: {}]   ;;  %s997_s5 = inlined_call_operand.hbm [shape: bf16[32,64], index: 5, kind: input, shape index: {}]   ;;  %s998_s6 = inlined_call_operand.hbm [shape: f32[1,64], index: 6, kind: input, shape index: {}]   ;;  %s999_s7 = inlined_call_operand.vmem [shape: bf16[64,32], index: 7, kind: input, shape index: {}]   ;;  %s1000_s8 = inlined_call_operand.vmem [shape: f32[1,32], index: 8, kind: input, shape index: {}]   ;;  %s1001_s9 = inlined_call_operand.vmem [shape: bf16[1,32], index: 9, kind: input, shape index: {}]   ;;  %s1002_s11 = inlined_call_operand.hbm [shape: f32[1,8], index: 11, kind: output, shape index: {0}]   ;;  %s1003_s12 = inlined_call_operand.hbm [shape: f32[8,32], index: 12, kind: output, shape index: {1}]   ;;  %s1004_s13 = inlined_call_operand.hbm [shape: f32[8,32], index: 13, kind: output, shape index: {2}]   ;;  %s1005_s1 = inlined_call_operand.vmem [shape: s32[8], index: 1, kind: input, shape index: {}]   ;;  %s1006_s10 = inlined_call_operand.<no memory space> [shape: f32[1,1], index: 10, kind: input, shape index: {}]  }
   0x1   :  { %s19_s27 = sshll.u32 %s993_s0, 4  ;;  %s23_s30 = sshll.u32 %s1005_s1, 4  ;;  %v27_v0 = vstv %s1006_s10  ;;  %s20_s27 = int_to_ptr.vmem [resolvable:$true] %s19_s27  ;;  %s24_s30 = int_to_ptr.vmem [resolvable:$true] %s23_s30 }
   0x2   :  { %28 = vst [vmem:[#allocation8] sm:$0x1] %v27_v0  ;;  %s693_s16 = scalar_lea.vmem %s20_s27, 16  ;;  %p698_p1 = scmp.lt.s32.totalorder %s20_s27, %s20_s27 }
   0x3   :  { %p694_p0 = scmp.ne.s32.totalorder %s20_s27, %s693_s16  ;;  %p699_p2 = scmp.lt.s32.totalorder %s693_s16, %s693_s16 }
   0x5   :  { %p700_p3 = por %p699_p2, %p698_p1 }
   0x7   :  { %p701_p4 = pnand %p700_p3, %p694_p0 }
   0x9   :  { %704 = shalt.err (!%p701_p4)  }
   0xa   :  { %s847_s17 = smov [#allocation6]   ;;  %s705_s0 = scalar_lea.vmem %s24_s30, 16 }
   0xb   :  { %22 = dma.vmem_to_smem %s20_s27, 16, %s847_s17, [#allocation5] }
   0xc   :  { %p706_p5 = scmp.ne.s32.totalorder %s24_s30, %s705_s0  ;;  %p710_p6 = scmp.lt.s32.totalorder %s24_s30, %s24_s30 }
   0xd   :  { %p711_p7 = scmp.lt.s32.totalorder %s705_s0, %s705_s0 }
   0xf   :  { %p712_p8 = por %p711_p7, %p710_p6 }
  0x11   :  { %p713_p9 = pnand %p712_p8, %p706_p5 }
  0x13   :  { %716 = shalt.err (!%p713_p9)  }
  0x14   :  { %s848_s1 = smov [#allocation7]  }
  0x15   :  { %26 = dma.vmem_to_smem %s24_s30, 16, %s848_s1, [#allocation5] }
  0x16   :  { %825 = dma.done.wait [#allocation5], 32 }
  0x17   :  { %826 = vsyncadd [#allocation5], 4294967264 }
  0x18   :  { %30 = sfence }
  0x19   :  { %31 = vsyncpa [#allocation10], 0 }
  0x1a   :  { %32 = vsyncpa [#allocation13], 0 }
  0x1b   :  { %33 = vsyncpa [#allocation11], 0 }
  0x1c   :  { %34 = vsyncpa [#allocation16], 0  ;;  %s849_s10 = smov [#allocation9]  }
  0x1d   :  { %s42_s18 = sshll.u32 %s849_s10, 4  ;;  %s43_s18 = int_to_ptr.vmem [resolvable:$true] %s42_s18 }
  0x1e   :  { %s725_s19 = scalar_lea.vmem %s43_s18, 256  ;;  %p730_p11 = scmp.lt.s32.totalorder %s43_s18, %s43_s18 }
  0x1f   :  { %p726_p10 = scmp.ne.s32.totalorder %s43_s18, %s725_s19  ;;  %p731_p12 = scmp.lt.s32.totalorder %s725_s19, %s725_s19 }
  0x21   :  { %p732_p13 = por %p731_p12, %p730_p11 }
  0x23   :  { %p733_p0 = pnand %p732_p13, %p726_p10 }
  0x25   :  { %736 = shalt.err (!%p733_p0)
}
  0x26   :  { %s850_s20 = smov 64   ;;  %s851_s21 = smov 4  }
  0x27   :  { %48 = dma.hbm_to_vmem [thread:$0]  %s997_s5, 256, %s43_s18, [#allocation10], %s850_s20, %s850_s20, %s851_s21  }
  0x28   :  { %s852_s24 = smov [#allocation12]  }
  0x29   :  { %s55_s25 = sshll.u32 %s852_s24, 4  ;;  %s56_s25 = int_to_ptr.vmem [resolvable:$true] %s55_s25 }
  0x2a   :  { %s745_s26 = scalar_lea.vmem %s56_s25, 16  ;;  %s749_s27 = scalar_lea.vmem %s56_s25, 32 }
  0x2b   :  { %p746_p1 = scmp.ne.s32.totalorder %s56_s25, %s745_s26  ;;  %p750_p2 = scmp.lt.s32.totalorder %s56_s25, %s56_s25 }
  0x2c   :  { %p751_p3 = scmp.lt.s32.totalorder %s749_s27, %s745_s26 }
  0x2e   :  { %p752_p4 = por %p751_p3, %p750_p2 }
  0x30   :  { %p753_p5 = pnand %p752_p4, %p746_p1 }
  0x32   :  { %756 = shalt.err (!%p753_p5)
}
  0x33   :  { %58 = dma.hbm_to_vmem [thread:$0]  %s998_s6, 16, %s56_s25, [#allocation13]  }
  0x34   :  { %827 = dma.done.wait [#allocation10], 256  }
  0x35   :  { %828 = vsyncadd [#allocation10], 4294967040 }
  0x36   :  { %829 = dma.done.wait [#allocation13], 16  }
  0x37   :  { %830 = vsyncadd [#allocation13], 4294967280  ;;  %s839_s5 = smov 0  }
  0x38 LB: > { %s82_s30 = sld [smem:[#allocation7 + %s841_s5]]  ;;  %s85_s0 = scalar_lea.vmem [#allocation2], %s841_s5  ;;  %s841_s5 = sphi %s839_s5, %s80_s5  }
  0x39   : > { %s83_s14 = sld [smem:[#allocation6 + %s841_s5]] }
  0x3e   : > { %s84_s17 = scalar_lea.vmem %s995_s3, %s82_s30 }
  0x3f   : > { %v104_v1 = vld [vmem:[%s84_s17] sm:$0x1] }
  0x40   : > { %105 = vst [vmem:[%s85_s0] sm:$0x1] %v104_v1 }
  0x41   : > { %131 = vsyncadd [#allocation4], 16  ;;  %s132_s10 = scalar_lea.vmem %s994_s2, %s83_s14  ;;  %s133_s18 = scalar_lea.vmem [#allocation3], %s841_s5 }
  0x42   : > { %v153_v2 = vld [vmem:[%s132_s10] sm:$0x1] }
  0x43   : > { %154 = vst [vmem:[%s133_s18] sm:$0x1] %v153_v2 }
  0x44   : > { %180 = vsyncadd [#allocation4 + $0x1], 16  ;;  %s80_s5 = sadd.s32 1, %s841_s5  }
  0x45   : > { %p77_p6 = scmp.ge.s32.totalorder %s80_s5, 8  }
  0x46   :  { %s843_s19 = smov (%p77_p6), 0  }
  0x47   :  { %79 = sbr.rel (!%p77_p6) target bundleno = 56 (0x38), region = 173 }
  0x4c LB: > { %831 = dma.done.wait [#allocation4], 16  ;;  %s845_s19 = sphi %s843_s19, %s186_s19  }
  0x4d   : > { %832 = vsyncadd [#allocation4], 4294967280 }
  0x4e   : > { %833 = dma.done.wait [#allocation4 + $0x1], 16 }
  0x4f   : > { %834 = vsyncadd [#allocation4 + $0x1], 4294967280  ;;  %s186_s19 = sadd.s32 1, %s845_s19  }
  0x50   : > { %p183_p7 = scmp.ge.s32.totalorder %s186_s19, 8  }
  0x51   :  { %v673_v3 = vld [vmem:[#allocation9 + $0x8] sm:$0xff] (%p183_p7)   ;;  %v853_v4 = vmov (%p183_p7), 0.0   ;;  %v674_v5 = vld [vmem:[%s996_s4 + $0x8] sm:$0xff] (%p183_p7)   ;;  %v675_v6 = vld [vmem:[#allocation9] sm:$0xff] (%p183_p7)   ;;  %vm854_vm0 = vmmov (%p183_p7), 0   ;;  %vm195_vm1 = vcmask (%p183_p7), 261120  }
  0x52   :  { %185 = sbr.rel (!%p183_p7) target bundleno = 76 (0x4c), region = 184  ;;  %610 = vmatprep.subr.bf16.mxu0 (%p183_p7), %v853_v4  ;;  %618 = vmatprep.subr.bf16.mxu1 (%p183_p7), %v853_v4  ;;  %v676_v7 = vld [vmem:[%s996_s4] sm:$0xff] (%p183_p7)   ;;  %v194_v8 = vld [vmem:[#allocation3] sm:$0xff] (%p183_p7)  ;;  %v677_v12 = vld [vmem:[%s999_s7 + $0x18] sm:$0xff] (%p183_p7)   ;;  %vm372_vm2 = vcmask (%p183_p7), 523264   ;;  %v855_v33 = vmov (%p183_p7), 0  }
  0x53   :  { %611 = vmatpush3.bf16.msra.mxu0 (%p183_p7), %v673_v3  ;;  %614 = vmatprep.mubr.msk.bf16.mxu0 (%p183_p7), %vm854_vm0, %v853_v4  ;;  %v193_v9 = vld [vmem:[#allocation2] sm:$0xff] (%p183_p7)  ;;  %v203_v10 = vpack.c.bf16 (%p183_p7), %v194_v8, %v194_v8  ;;  %197 = vst.msk [vmem:[#allocation17] sm:$0xff] (%p183_p7), %vm195_vm1, %v194_v8  ;;  %v678_v13 = vld [vmem:[%s999_s7 + $0x10] sm:$0xff] (%p183_p7)   ;;  %v679_v14 = vld [vmem:[%s999_s7 + $0x8] sm:$0xff] (%p183_p7)  }
  0x54   :  { %619 = vmatpush3.bf16.msra.mxu1 (%p183_p7), %v674_v5  ;;  %612 = vmatprep.subr.bf16.mxu0 (%p183_p7), %v853_v4  ;;  %196 = vst.msk [vmem:[#allocation15] sm:$0xff] (%p183_p7), %vm195_vm1, %v193_v9  ;;  %v198_v11 = vpack.c.bf16 (%p183_p7), %v193_v9, %v193_v9  ;;  %v680_v15 = vld [vmem:[%s999_s7] sm:$0xff] (%p183_p7)   ;;  %v424_v32 = vld [vmem:[#allocation8] sm:$0x1] (%p183_p7) }
  0x55   :  { %620 = vmatprep.subr.bf16.mxu1 (%p183_p7), %v853_v4  ;;  %622 = vmatprep.mubr.msk.bf16.mxu1 (%p183_p7), %vm854_vm0, %v853_v4  ;;  %v584_v18 = vld [vmem:[#allocation12] ss:$0 sm:$0xff] (%p183_p7)  ;;  %v586_v34 = vld [vmem:[%s1000_s8] ss:$0 sm:$0xff] (%p183_p7)  ;;  %s856_s8 = smov (%p183_p7), [#allocation15]  }
  0x56   :  { %672 = vset.pattern.permute.xlu0 (%p183_p7), %v855_v33  ;;  %v422_v46 = vld [vmem:[%s1001_s9] sm:$0x1] (%p183_p7)  ;;  %s504_s14 = sshll.u32 (%p183_p7), %s856_s8, 4  ;;  %s505_s14 = int_to_ptr.vmem [resolvable:$true] %s504_s14 }
  0x57   :  { %613 = vmatpush3.bf16.msra.mxu0 %v675_v6  ;;  %427 = vperm.xlu0 %672, %v424_v32   ;;  %s757_s15 = scalar_lea.vmem %s505_s14, 128  ;;  %p762_p9 = scmp.lt.s32.totalorder %s505_s14, %s505_s14 }
  0x58   :  { %621 = vmatpush3.bf16.msra.mxu1 %v676_v7  ;;  %626 = vmatprep.subr.bf16.mxu0 %v853_v4  ;;  %p758_p8 = scmp.ne.s32.totalorder %s505_s14, %s757_s15  ;;  %p763_p10 = scmp.lt.s32.totalorder %s757_s15, %s757_s15 }
  0x59   :  { %638 = vmatprep.subr.bf16.mxu1 %v853_v4 }
  0x5a   :  { %615 = vmatmul.mubr.msk.bf16.vlgmr.msra.gmra.mxu0 %vm195_vm1, %v203_v10  ;;  %p764_p11 = por %p763_p10, %p762_p9 }
  0x5b   :  { %623 = vmatmul.mubr.msk.bf16.vlgmr.msra.gmra.mxu1 %vm195_vm1, %v198_v11  ;;  %634 = vmatprep.mubr.msk.bf16.mxu0 %vm854_vm0, %v853_v4 }
  0x5c   :  { %640 = vmatprep.mubr.msk.bf16.mxu1 %vm854_vm0, %v853_v4  ;;  %627 = vmatpush3.bf16.msra.mxu0 %v677_v12  ;;  %p765_p12 = pnand %p764_p11, %p758_p8 }
  0x5d   :  { %628 = vmatprep.subr.bf16.mxu0 %v853_v4 }
  0x60   :  { %629 = vmatpush3.bf16.msra.mxu0 %v678_v13 }
  0x61   :  { %630 = vmatprep.subr.bf16.mxu0 %v853_v4 }
  0x64   :  { %631 = vmatpush3.bf16.msra.mxu0 %v679_v14 }
  0x65   :  { %632 = vmatprep.subr.bf16.mxu0 %v853_v4 }
  0x68   :  { %633 = vmatpush3.bf16.msra.mxu0 %v680_v15 }
 0x11a   :  { %v257_v16 = vpop.f32.mrf.mxu0 }
 0x11b   :  { %v312_v17 = vpop.f32.mrf.mxu1 }
 0x11c   :  { %v313_v19 = vadd.f32 %v312_v17, %v257_v16  ;;  %v616_v20 = vpop.f32.mrf.mxu0 }
 0x11d   :  { %v624_v21 = vpop.f32.mrf.mxu1 }
 0x11e   :  { %v325_v22 = vadd.f32 %v584_v18, %v313_v19  ;;  %v260_v23 = vpop.f32.mrf.mxu0 }
 0x11f   :  { %v315_v24 = vpop.f32.mrf.mxu1 }
 0x120   :  { %v585_v25 = vmul.f32 -1.442695, %v325_v22  ;;  %v617_v26 = vpop.f32.mrf.mxu0 }
 0x121   :  { %v625_v27 = vpop.f32.mrf.mxu1 }
 0x122   :  { %681 = vpow2.f32 %v585_v25 }
 0x12f   :  { %v682_v28 = vpop.eup %681 }
 0x130   :  { %v329_v29 = vadd.f32 1.0, %v682_v28 }
 0x132   :  { %683 = vrcp.f32 %v329_v29 }
 0x13f   :  { %v684_v30 = vpop.eup %683 }
 0x140   :  { %v332_v31 = vpack.c.bf16 %v684_v30, %v684_v30 }
 0x142   :  { %635 = vmatmul.mubr.msk.bf16.vlgmr.msra.gmra.mxu0 %vm372_vm2, %v332_v31 }
 0x202   :  { %v410_v35 = vpop.f32.mrf.mxu0 }
 0x203   :  { %v411_v36 = vadd.f32 %v586_v34, %v410_v35 }
 0x204   :  { %v636_v37 = vpop.f32.mrf.mxu0 }
 0x205   :  { %v592_v38 = vmul.f32 -1.442695, %v411_v36 }
 0x206   :  { %v413_v39 = vpop.f32.mrf.mxu0 }
 0x207   :  { %685 = vpow2.f32 %v592_v38 }
 0x208   :  { %v637_v40 = vpop.f32.mrf.mxu0 }
 0x214   :  { %v686_v41 = vpop.eup %685 }
 0x215   :  { %v419_v42 = vadd.f32 1.0, %v686_v41 }
 0x217   :  { %687 = vrcp.f32 %v419_v42 }
 0x224   :  { %v688_v43 = vpop.eup %687 }
 0x225   :  { %v423_v44 = vpack.c.bf16 %v688_v43, %v688_v43 }
 0x227   :  { %v438_v45 = vsel %vm195_vm1, %v423_v44, 0 }
 0x228   :  { %639 = vmatpush3.bf16.xpose.msra.mxu1 %v438_v45 }
 0x22f   :  { %641 = vmatmul.mubr.msk.bf16.vlgmr.msra.gmra.mxu1 %vm195_vm1, %v422_v46 }
 0x230   :  { %768 = shalt.err (!%p765_p12)
}
 0x231   :  { %507 = dma.vmem_to_hbm [thread:$0]  %s505_s14, 128, %s1003_s12, [#allocation16]  }
 0x232   :  { %s857_s0 = smov [#allocation17]  }
 0x233   :  { %s514_s1 = sshll.u32 %s857_s0, 4  ;;  %s515_s1 = int_to_ptr.vmem [resolvable:$true] %s514_s1 }
 0x234   :  { %s777_s9 = scalar_lea.vmem %s515_s1, 128  ;;  %p782_p0 = scmp.lt.s32.totalorder %s515_s1, %s515_s1 }
 0x235   :  { %p778_p13 = scmp.ne.s32.totalorder %s515_s1, %s777_s9  ;;  %p783_p1 = scmp.lt.s32.totalorder %s777_s9, %s777_s9 }
 0x237   :  { %p784_p2 = por %p783_p1, %p782_p0 }
 0x239   :  { %p785_p3 = pnand %p784_p2, %p778_p13 }
 0x23b   :  { %788 = shalt.err (!%p785_p3)
}
 0x23c   :  { %517 = dma.vmem_to_hbm [thread:$0]  %s515_s1, 128, %s1004_s13, [#allocation16]   ;;  %v430_v47 = vlaneseq  ;;  %v428_v50 = vpop.permute.xlu0 %427  ;;  %vm486_vm3 = vcmask 57344  }
 0x23d   :  { %s858_s12 = smov [#allocation14]  }
 0x23e   :  { %v431_v48 = vshrl.u32 %v430_v47, 7  ;;  %s494_s18 = sshll.u32 %s858_s12, 4  ;;  %s495_s18 = int_to_ptr.vmem [resolvable:$true] %s494_s18 }
 0x23f   :  { %s797_s13 = scalar_lea.vmem %s495_s18, 16  ;;  %s801_s19 = scalar_lea.vmem %s495_s18, 32 }
 0x240   :  { %v432_v49 = vsub.s32 0, %v431_v48  ;;  %p798_p4 = scmp.ne.s32.totalorder %s495_s18, %s797_s13  ;;  %p802_p5 = scmp.lt.s32.totalorder %s495_s18, %s495_s18 }
 0x241   :  { %p803_p6 = scmp.lt.s32.totalorder %s801_s19, %s797_s13 }
 0x242   :  { %v433_v51 = vrot.slane %v428_v50, %v432_v49 }
 0x243   :  { %p804_p7 = por %p803_p6, %p802_p5 }
 0x245   :  { %p805_p8 = pnand %p804_p7, %p798_p4 }
 0x2ef   :  { %v474_v52 = vpop.f32.mrf.mxu1 }
 0x2f0   :  { %v475_v53 = vadd.f32 %v474_v52, %v433_v51 }
 0x2f1   :  { %v642_v54 = vpop.f32.mrf.mxu1 }
 0x2f2   :  { %v594_v55 = vmul.f32 -1.442695, %v475_v53 }
 0x2f3   :  { %v477_v56 = vpop.f32.mrf.mxu1 }
 0x2f4   :  { %689 = vpow2.f32 %v594_v55 }
 0x2f5   :  { %v643_v57 = vpop.f32.mrf.mxu1 }
 0x301   :  { %v690_v58 = vpop.eup %689 }
 0x302   :  { %v483_v59 = vadd.f32 1.0, %v690_v58 }
 0x304   :  { %691 = vrcp.f32 %v483_v59 }
 0x311   :  { %v692_v60 = vpop.eup %691 }
 0x312   :  { %487 = vst.msk [vmem:[#allocation14] sm:$0x1] %vm486_vm3, %v692_v60 }
 0x313   :  { %808 = shalt.err (!%p805_p8)
}
 0x314   :  { %497 = dma.vmem_to_hbm [thread:$0]  %s495_s18, 16, %s1002_s11, [#allocation11]  }
 0x315   :  { %835 = dma.done.wait [#allocation11], 16  }
 0x316   :  { %836 = vsyncadd [#allocation11], 4294967280 }
 0x317   :  { %837 = dma.done.wait [#allocation16], 256  }
 0x318   :  { %838 = vsyncadd [#allocation16], 4294967040 }
 0x319   :  { %527 = vsyncpa [#allocation10], 1 }
 0x31a   :  { %528 = vsyncpa [#allocation13], 1 }
 0x31b   :  { %529 = vsyncpa [#allocation11], 1 }
 0x31c   :  { %530 = vsyncpa [#allocation16], 1 }
 0x31d   :  { %531 = vsyncmov [#allocation4] }
 0x320   :  { %s532_s2 = vpop.sfrf %531 }
 0x321   :  { %p595_p9 = scmp.ne.s32.totalorder %s532_s2, 0 }
 0x323   :  { %536 = shalt.err (%p595_p9)  }
 0x324   :  { %538 = vsyncmov [#allocation4 + $0x1] }
 0x327   :  { %s539_s3 = vpop.sfrf %538 }
 0x328   :  { %p596_p10 = scmp.ne.s32.totalorder %s539_s3, 0 }
 0x32a   :  { %543 = shalt.err (%p596_p10)  }

</bundles_post_ra>
